<compile_context>
chip_gen: v5e
topology: v5e:2x2
jax: 0.10.0
libtpu: 0.0.40
codegen_flags: <defaults>
</compile_context>

<pallas_src>
import functools

import jax
import jax.numpy as jnp
import numpy as np
from jax import lax
from jax.experimental import pallas as pl
from jax.experimental.pallas import tpu as pltpu


def mlp2_kernel(x_ref, w1_ref, b1_ref, w2_ref, b2_ref, o_ref):
    """matmul -> bias -> ReLU -> (dropout=identity) -> row-dot -> bias -> sigmoid."""
    x = x_ref[...].astype(w1_ref.dtype)                                 # (tb, F)
    h = jnp.dot(x, w1_ref[...], preferred_element_type=jnp.float32)    # (tb, Hp)
    h = jnp.maximum(h + b1_ref[...], 0.0)                              # ReLU
    # TODO(synk): nn.Dropout(0.5) is identity in eval mode; training-mode
    # random masking is not implemented.
    # Second Linear has out-dim 1: contract (1,Hp) with (tb,Hp) so the result
    # lands already lane-dense as a (1, tb) row; padded Hp lanes are zero.
    y = lax.dot_general(w2_ref[...], h, (((1,), (1,)), ((), ())),
                        preferred_element_type=jnp.float32)            # (1, tb)
    o_ref[...] = jax.nn.sigmoid(y + b2_ref[0, 0])[None]                # (1,1,tb)


def _round_up(x, m):
    return ((x + m - 1) // m) * m


def _choose_tile(batch, tile_b):
    """Batch tile: multiple of 8, <= tile_b, and >= 2 grid steps when the batch
    is big enough (so 'parallel' can shard across v7x's two TensorCores)."""
    b8 = _round_up(max(batch, 1), 8)
    tb = min(_round_up(tile_b, 8), b8)
    if b8 <= tb and b8 >= 16:     # single step would cover everything: split in 2
        tb = _round_up(-(-b8 // 2), 8)
    return max(tb, 8)


@functools.partial(jax.jit, static_argnames=("tile_b", "mxu_dtype"))
def mlp2_forward(sim_matrices, params, *, tile_b=2048, mxu_dtype=jnp.float32):
    """sim_matrices: (B, D, D) float32 -> (B, 1) float32 (MLP2.forward, eval)."""
    B, D, _ = sim_matrices.shape
    F = D * D
    x = sim_matrices.reshape(B, F).astype(jnp.float32)      # flatten2()

    w1, b1, w2, b2 = params                                  # (H,F),(H,),(1,H),(1,)
    H = w1.shape[0]
    H_pad = _round_up(H, 128)

    # Zero-padded, lane-dense parameter layouts (one-time transform).
    w1_t = jnp.zeros((F, H_pad), jnp.float32).at[:, :H].set(w1.T).astype(mxu_dtype)
    b1_p = jnp.zeros((1, H_pad), jnp.float32).at[:, :H].set(b1.reshape(1, H))
    w2_p = jnp.zeros((1, H_pad), jnp.float32).at[:, :H].set(w2.reshape(1, H))
    b2_s = b2.reshape(1, 1).astype(jnp.float32)

    tb = _choose_tile(B, tile_b)
    grid_b = -(-B // tb)                                     # ragged final block OK

    # Scoped-VMEM budget: double-buffered x tile + h intermediate + resident
    # weights + lane-dense output row, with margin.  Safe on v5e/v6e/v7x.
    itemsize_w1 = jnp.dtype(mxu_dtype).itemsize
    vmem_need = (4 * (2 * tb * F + 2 * tb * H_pad + 8 * H_pad + 4 * tb)
                 + 2 * F * H_pad * itemsize_w1)
    vmem_limit = int(min(max(2 * vmem_need, 32 << 20), 48 << 20))

    cost = pl.CostEstimate(
        flops=int(2 * grid_b * tb * H_pad * (F + 1) + 3 * grid_b * tb * H_pad),
        transcendentals=int(grid_b * tb),
        bytes_accessed=int(4 * (B * F + H_pad * (F + 2) + 1 + grid_b * tb)),
    )

    out = pl.pallas_call(
        mlp2_kernel,
        out_shape=jax.ShapeDtypeStruct((grid_b, 1, tb), jnp.float32),
        grid=(grid_b,),
        in_specs=[
            pl.BlockSpec((tb, F), lambda i: (i, 0)),              # x: batch-tiled
            pl.BlockSpec((F, H_pad), lambda i: (0, 0)),           # w1: VMEM-resident
            pl.BlockSpec((1, H_pad), lambda i: (0, 0)),           # b1
            pl.BlockSpec((1, H_pad), lambda i: (0, 0)),           # w2 row
            pl.BlockSpec(memory_space=pltpu.MemorySpace.SMEM),    # b2 scalar
        ],
        out_specs=pl.BlockSpec((1, 1, tb), lambda i: (i, 0, 0)),  # lane-dense row
        compiler_params=pltpu.CompilerParams(
            dimension_semantics=("parallel",),
            vmem_limit_bytes=vmem_limit),
        cost_estimate=cost,
    )(x, w1_t, b1_p, w2_p, b2_s)
    # (G, 1, tb) -> (G*tb, 1); trailing padded rows (if any) are discarded.
    return out.reshape(grid_b * tb, 1)[:B]


def init_params(key, matrix_dim, layer_size_factor=(1, 5)):
    """Deterministic init mirroring nn.Linear's U(-1/sqrt(fan_in), 1/sqrt(fan_in)),
    weight shape (out, in), bias shape (out,)."""
    feature_len = matrix_dim * matrix_dim
    in1 = feature_len // layer_size_factor[0]
    out1 = feature_len // layer_size_factor[1]
    in2 = out1
    out2 = 1
    k1, k2, k3, k4 = jax.random.split(key, 4)
    bound1 = 1.0 / float(np.sqrt(in1))
    bound2 = 1.0 / float(np.sqrt(in2))
    w1 = jax.random.uniform(k1, (out1, in1), jnp.float32, -bound1, bound1)
    b1 = jax.random.uniform(k2, (out1,), jnp.float32, -bound1, bound1)
    w2 = jax.random.uniform(k3, (out2, in2), jnp.float32, -bound2, bound2)
    b2 = jax.random.uniform(k4, (out2,), jnp.float32, -bound2, bound2)
    return w1, b1, w2, b2


def reference_forward(sim_matrices, params):
    """Pure-JAX reference for correctness checking (eval-mode MLP2.forward)."""
    B, D, _ = sim_matrices.shape
    x = sim_matrices.reshape(B, D * D).astype(jnp.float32)
    w1, b1, w2, b2 = params
    h = jnp.maximum(x @ w1.T + b1[None, :], 0.0)
    return jax.nn.sigmoid(h @ w2.T + b2[None, :])


if __name__ == "__main__":
    matrix_dim = 16          # F = 256 (lane-aligned), hidden = 256 // 5 = 51
    key = jax.random.PRNGKey(0)
    k_data, k_param = jax.random.split(key)
    params = init_params(k_param, matrix_dim)

    # Case 1: tiny batch (single, partially-filled block).
    batch = 2
    sim_small = jax.random.normal(k_data, (batch, matrix_dim, matrix_dim),
                                  dtype=jnp.float32)
    out = jax.block_until_ready(mlp2_forward(sim_small, params))
    ref = reference_forward(sim_small, params)
    assert out.shape == (batch, 1), out.shape
    np.testing.assert_allclose(np.asarray(out), np.asarray(ref),
                               rtol=1e-5, atol=1e-5)

    # Case 2: multi-step grid with a ragged final block (exercises the
    # lane-dense output slab and the >=2-step megacore split).
    batch2 = 300
    sim_big = jax.random.normal(k_data, (batch2, matrix_dim, matrix_dim),
                                dtype=jnp.float32)
    out2 = jax.block_until_ready(mlp2_forward(sim_big, params))
    ref2 = reference_forward(sim_big, params)
    assert out2.shape == (batch2, 1), out2.shape
    np.testing.assert_allclose(np.asarray(out2), np.asarray(ref2),
                               rtol=1e-5, atol=1e-5)

    # Case 3: bf16 MXU-input fast path (v5e) — f32 accumulation, looser tol.
    out3 = jax.block_until_ready(
        mlp2_forward(sim_big, params, mxu_dtype=jnp.bfloat16))
    np.testing.assert_allclose(np.asarray(out3), np.asarray(ref2),
                               rtol=3e-2, atol=3e-2)

    print("KERNEL_OK")
</pallas_src>

<mosaic_0001>
module attributes {stable_mosaic.version = 11 : i64} {
  func.func @mlp2_kernel(%arg0: i32, %arg1: memref<8x256xf32, #tpu.memory_space<vmem>>, %arg2: memref<256x128xf32, #tpu.memory_space<vmem>>, %arg3: memref<1x128xf32, #tpu.memory_space<vmem>>, %arg4: memref<1x128xf32, #tpu.memory_space<vmem>>, %arg5: memref<1x1xf32, #tpu.memory_space<smem>>, %arg6: memref<1x1x8xf32, #tpu.memory_space<vmem>>) attributes {dimension_semantics = [#tpu.dimension_semantics<parallel>], iteration_bounds = array<i64: 1>, scalar_prefetch = 0 : i64, scratch_operands = 0 : i64, tpu.core_type = #tpu.core_type<tc>, window_params = [{transform_indices = @transform_0, window_bounds = array<i64: 8, 256>}, {pipeline_mode = #tpu.pipeline_mode<synchronous>, transform_indices = @transform_1, window_bounds = array<i64: 256, 128>}, {pipeline_mode = #tpu.pipeline_mode<synchronous>, transform_indices = @transform_2, window_bounds = array<i64: 1, 128>}, {pipeline_mode = #tpu.pipeline_mode<synchronous>, transform_indices = @transform_3, window_bounds = array<i64: 1, 128>}, {transform_indices = @transform_4, window_bounds = array<i64: 1, 1>}, {transform_indices = @transform_5, window_bounds = array<i64: 1, 1, 8>}]} {
    %c0 = arith.constant 0 : index
    %c0_0 = arith.constant 0 : index
    %0 = vector.load %arg1[%c0, %c0_0] : memref<8x256xf32, #tpu.memory_space<vmem>>, vector<8x256xf32>
    %c0_1 = arith.constant 0 : index
    %c0_2 = arith.constant 0 : index
    %1 = vector.load %arg2[%c0_1, %c0_2] : memref<256x128xf32, #tpu.memory_space<vmem>>, vector<256x128xf32>
    %cst = arith.constant dense<0.000000e+00> : vector<8x128xf32>
    %2 = tpu.matmul %0, %1, %cst {dimension_numbers = #tpu.dot_dimension_numbers<[1], [0], [0], [1], [0, 0, 1, 1], [], []>} : vector<8x256xf32>, vector<256x128xf32>, vector<8x128xf32> -> vector<8x128xf32>
    %c0_3 = arith.constant 0 : index
    %c0_4 = arith.constant 0 : index
    %3 = vector.load %arg3[%c0_3, %c0_4] : memref<1x128xf32, #tpu.memory_space<vmem>>, vector<1x128xf32>
    %4 = vector.broadcast %3 : vector<1x128xf32> to vector<8x128xf32>
    %5 = arith.addf %2, %4 : vector<8x128xf32>
    %cst_5 = arith.constant 0.000000e+00 : f32
    %6 = vector.broadcast %cst_5 : f32 to vector<8x128xf32>
    %7 = arith.maximumf %5, %6 : vector<8x128xf32>
    %c0_6 = arith.constant 0 : index
    %c0_7 = arith.constant 0 : index
    %8 = vector.load %arg4[%c0_6, %c0_7] : memref<1x128xf32, #tpu.memory_space<vmem>>, vector<1x128xf32>
    %cst_8 = arith.constant dense<0.000000e+00> : vector<1x8xf32>
    %9 = tpu.matmul %8, %7, %cst_8 {dimension_numbers = #tpu.dot_dimension_numbers<[1], [1], [0], [0], [0, 0, 1, 0], [], []>} : vector<1x128xf32>, vector<8x128xf32>, vector<1x8xf32> -> vector<1x8xf32>
    %c0_9 = arith.constant 0 : index
    %c0_10 = arith.constant 0 : index
    %10 = memref.load %arg5[%c0_9, %c0_10] : memref<1x1xf32, #tpu.memory_space<smem>>
    %11 = vector.broadcast %10 : f32 to vector<1x8xf32>
    %12 = arith.addf %9, %11 : vector<1x8xf32>
    %13 = arith.negf %12 : vector<1x8xf32>
    %14 = math.exp %13 : vector<1x8xf32>
    %cst_11 = arith.constant 1.000000e+00 : f32
    %15 = vector.broadcast %cst_11 : f32 to vector<1x8xf32>
    %16 = arith.addf %15, %14 : vector<1x8xf32>
    %17 = arith.divf %15, %16 : vector<1x8xf32>
    %18 = vector.shape_cast %17 : vector<1x8xf32> to vector<1x1x8xf32>
    %c0_12 = arith.constant 0 : index
    %c0_13 = arith.constant 0 : index
    %c0_14 = arith.constant 0 : index
    %19 = vector.load %arg6[%c0_12, %c0_13, %c0_14] : memref<1x1x8xf32, #tpu.memory_space<vmem>>, vector<1x1x8xf32>
    tpu.vector_store %arg6[%c0_12, %c0_13, %c0_14], %18 {strides = array<i32>} : memref<1x1x8xf32, #tpu.memory_space<vmem>>, vector<1x1x8xf32>,
    return
  }
  func.func @transform_0(%arg0: i32) -> (i32, i32) {
    %c0_i32 = arith.constant 0 : i32
    %c0_i32_0 = arith.constant 0 : i32
    return %arg0, %c0_i32 : i32, i32
  }
  func.func @transform_1(%arg0: i32) -> (i32, i32) {
    %c0_i32 = arith.constant 0 : i32
    %c0_i32_0 = arith.constant 0 : i32
    %c0_i32_1 = arith.constant 0 : i32
    return %c0_i32, %c0_i32_0 : i32, i32
  }
  func.func @transform_2(%arg0: i32) -> (i32, i32) {
    %c0_i32 = arith.constant 0 : i32
    %c0_i32_0 = arith.constant 0 : i32
    %c0_i32_1 = arith.constant 0 : i32
    return %c0_i32, %c0_i32_0 : i32, i32
  }
  func.func @transform_3(%arg0: i32) -> (i32, i32) {
    %c0_i32 = arith.constant 0 : i32
    %c0_i32_0 = arith.constant 0 : i32
    %c0_i32_1 = arith.constant 0 : i32
    return %c0_i32, %c0_i32_0 : i32, i32
  }
  func.func @transform_4(%arg0: i32) -> (i32, i32) {
    %c0_i32 = arith.constant 0 : i32
    %c0_i32_0 = arith.constant 0 : i32
    %c0_i32_1 = arith.constant 0 : i32
    return %c0_i32, %c0_i32_0 : i32, i32
  }
  func.func @transform_5(%arg0: i32) -> (i32, i32, i32) {
    %c0_i32 = arith.constant 0 : i32
    %c0_i32_0 = arith.constant 0 : i32
    %c0_i32_1 = arith.constant 0 : i32
    return %arg0, %c0_i32, %c0_i32_0 : i32, i32, i32
  }
}

</mosaic_0001>

<bundles_post_ra>
// kernel: mlp2_forward.1
= control target key start
LH: loop header
LB: loop body
LE: loop exit
PB: predicated region body
PF: predicated region fallthrough
CT: control target
= control target key end

     0   :  { %vm159_vm3 = vcmask 57344   ;;  %s321_s1 = inlined_call_operand.vmem [shape: f32[256,128], index: 1, kind: input, shape index: {}]   ;;  %s322_s0 = inlined_call_operand.vmem [shape: f32[2,256], index: 0, kind: input, shape index: {}]   ;;  %s323_s2 = inlined_call_operand.vmem [shape: f32[1,128], index: 2, kind: input, shape index: {}]   ;;  %s324_s3 = inlined_call_operand.vmem [shape: f32[1,128], index: 3, kind: input, shape index: {}]   ;;  %s325_s4 = inlined_call_operand.<no memory space> [shape: f32[1,1], index: 4, kind: input, shape index: {}]   ;;  %s326_s5 = inlined_call_operand.vmem [shape: f32[1,1,8], index: 5, kind: output, shape index: {}]  }
   0x1   :  { %v40_v0 = vld [vmem:[%s321_s1 + $0x78] sm:$0xff]  ;;  %v39_v1 = vld [vmem:[%s321_s1 + $0x70] sm:$0xff]  ;;  %v38_v4 = vld [vmem:[%s321_s1 + $0x68] sm:$0xff]  ;;  %v119_v45 = vstv %s325_s4 }
   0x2   :  { %v56_v2 = vld [vmem:[%s321_s1 + $0xf8] sm:$0xff]  ;;  %76 = vmatpush.msra.mxu0 %v40_v0  ;;  %v55_v3 = vld [vmem:[%s321_s1 + $0xf0] sm:$0xff]  ;;  %v54_v5 = vld [vmem:[%s321_s1 + $0xe8] sm:$0xff] }
   0x3   :  { %96 = vmatpush.msra.mxu1 %v56_v2  ;;  %v37_v6 = vld [vmem:[%s321_s1 + $0x60] sm:$0xff]  ;;  %v36_v8 = vld [vmem:[%s321_s1 + $0x58] sm:$0xff]  ;;  %v35_v10 = vld [vmem:[%s321_s1 + $0x50] sm:$0xff] }
   0x4   :  { %77 = vmatpush.msra.mxu0 %v39_v1  ;;  %v53_v7 = vld [vmem:[%s321_s1 + $0xe0] sm:$0xff]  ;;  %v52_v9 = vld [vmem:[%s321_s1 + $0xd8] sm:$0xff]  ;;  %v51_v11 = vld [vmem:[%s321_s1 + $0xd0] sm:$0xff] }
   0x5   :  { %97 = vmatpush.msra.mxu1 %v55_v3  ;;  %v34_v12 = vld [vmem:[%s321_s1 + $0x48] sm:$0xff]  ;;  %v21_v14 = vld [vmem:[%s322_s0] sm:$0xf]  ;;  %v22_v15 = vld [vmem:[%s322_s0 + $0x4] sm:$0xf] }
   0x6   :  { %78 = vmatpush.msra.mxu0 %v38_v4  ;;  %v50_v13 = vld [vmem:[%s321_s1 + $0xc8] sm:$0xff]  ;;  %65 = vst [vmem:[#allocation1] ss:$4 sm:$0xff] %v21_v14  ;;  %v33_v18 = vld [vmem:[%s321_s1 + $0x40] sm:$0xff]  ;;  %v32_v20 = vld [vmem:[%s321_s1 + $0x38] sm:$0xff] }
   0x7   :  { %98 = vmatpush.msra.mxu1 %v54_v5  ;;  %v23_v16 = vld [vmem:[%s322_s0 + $0x8] sm:$0xf]  ;;  %v24_v17 = vld [vmem:[%s322_s0 + $0xc] sm:$0xf]  ;;  %v49_v19 = vld [vmem:[%s321_s1 + $0xc0] sm:$0xff] }
   0x8   :  { %79 = vmatpush.msra.mxu0 %v37_v6  ;;  %67 = vst [vmem:[#allocation1 + $0x1] ss:$4 sm:$0xff] %v22_v15  ;;  %v48_v21 = vld [vmem:[%s321_s1 + $0xb8] sm:$0xff]  ;;  %v31_v22 = vld [vmem:[%s321_s1 + $0x30] sm:$0xff]  ;;  %v30_v24 = vld [vmem:[%s321_s1 + $0x28] sm:$0xff] }
   0x9   :  { %99 = vmatpush.msra.mxu1 %v53_v7  ;;  %69 = vst [vmem:[#allocation1 + $0x2] ss:$4 sm:$0xff] %v23_v16  ;;  %v47_v23 = vld [vmem:[%s321_s1 + $0xb0] sm:$0xff]  ;;  %v46_v25 = vld [vmem:[%s321_s1 + $0xa8] sm:$0xff]  ;;  %v29_v26 = vld [vmem:[%s321_s1 + $0x20] sm:$0xff] }
   0xa   :  { %80 = vmatpush.msra.mxu0 %v36_v8  ;;  %71 = vst [vmem:[#allocation1 + $0x3] ss:$4 sm:$0xff] %v24_v17  ;;  %v45_v27 = vld [vmem:[%s321_s1 + $0xa0] sm:$0xff]  ;;  %v28_v28 = vld [vmem:[%s321_s1 + $0x18] sm:$0xff]  ;;  %v27_v30 = vld [vmem:[%s321_s1 + $0x10] sm:$0xff] }
   0xb   :  { %100 = vmatpush.msra.mxu1 %v52_v9  ;;  %v44_v29 = vld [vmem:[%s321_s1 + $0x98] sm:$0xff]  ;;  %v43_v31 = vld [vmem:[%s321_s1 + $0x90] sm:$0xff]  ;;  %v26_v32 = vld [vmem:[%s321_s1 + $0x8] sm:$0xff] }
   0xc   :  { %81 = vmatpush.msra.mxu0 %v35_v10  ;;  %v42_v33 = vld [vmem:[%s321_s1 + $0x88] sm:$0xff]  ;;  %v25_v34 = vld [vmem:[%s321_s1] sm:$0xff] }
   0xd   :  { %101 = vmatpush.msra.mxu1 %v51_v11  ;;  %v41_v35 = vld [vmem:[%s321_s1 + $0x80] sm:$0xff] }
   0xe   :  { %82 = vmatpush.msra.mxu0 %v34_v12  ;;  %v166_v38 = vld [vmem:[%s323_s2] ss:$0 sm:$0xff] }
   0xf   :  { %102 = vmatpush.msra.mxu1 %v50_v13  ;;  %v117_v44 = vld [vmem:[%s324_s3] sm:$0x1] }
  0x10   :  { %83 = vmatpush.msra.mxu0 %v33_v18 }
  0x11   :  { %103 = vmatpush.msra.mxu1 %v49_v19  ;;  %v72_v36 = vld.sshfl [vmem:[#allocation1] sm:$0xff pattern:$0x73625140]  ;;  %v73_v37 = vld.sshfl [vmem:[#allocation1 + $0x8] sm:$0xff pattern:$0x73625140] }
  0x12   :  { %84 = vmatpush.msra.mxu0 %v32_v20 }
  0x13   :  { %104 = vmatpush.msra.mxu1 %v48_v21 }
  0x14   :  { %85 = vmatpush.msra.mxu0 %v31_v22 }
  0x15   :  { %105 = vmatpush.msra.mxu1 %v47_v23 }
  0x16   :  { %86 = vmatpush.msra.mxu0 %v30_v24 }
  0x17   :  { %106 = vmatpush.msra.mxu1 %v46_v25 }
  0x18   :  { %87 = vmatpush.msra.mxu0 %v29_v26 }
  0x19   :  { %107 = vmatpush.msra.mxu1 %v45_v27 }
  0x1a   :  { %88 = vmatpush.msra.mxu0 %v28_v28 }
  0x1b   :  { %108 = vmatpush.msra.mxu1 %v44_v29 }
  0x1c   :  { %89 = vmatpush.msra.mxu0 %v27_v30 }
  0x1d   :  { %109 = vmatpush.msra.mxu1 %v43_v31 }
  0x1e   :  { %90 = vmatpush.msra.mxu0 %v26_v32 }
  0x1f   :  { %110 = vmatpush.msra.mxu1 %v42_v33 }
  0x20   :  { %91 = vmatpush.msra.mxu0 %v25_v34 }
  0x21   :  { %111 = vmatpush.msra.mxu1 %v41_v35  ;;  %92 = vmatmul.f32.vlgmr.msra.gmra.mxu0 %v72_v36 }
  0x22   :  { %112 = vmatmul.f32.vlgmr.msra.gmra.mxu1 %v73_v37 }
  0x9e   :  { %v93_v39 = vpop.f32.mrf.mxu0 }
  0x9f   :  { %v113_v40 = vpop.f32.mrf.mxu1  ;;  %v94_v41 = vadd.f32 %v166_v38, %v93_v39 }
  0xa1   :  { %v114_v42 = vadd.f32 %v113_v40, %v94_v41 }
  0xa3   :  { %v116_v43 = vmax.f32 %v114_v42, 0.0 }
  0xa5   :  { %135 = vmatpush.xpose.msra.mxu2 %v116_v43 }
  0xa8   :  { %136 = vmatmul.f32.vlgmr.msra.gmra.mxu2 %v117_v44 }
 0x12b   :  { %v137_v46 = vpop.f32.mrf.mxu2 }
 0x12c   :  { %v138_v47 = vadd.f32 %v137_v46, %v119_v45 }
 0x12e   :  { %v165_v48 = vmul.f32 -1.442695, %v138_v47 }
 0x130   :  { %167 = vpow2.f32 %v165_v48 }
 0x136   :  { %v168_v49 = vpop.eup %167 }
 0x137   :  { %v143_v50 = vadd.f32 1.0, %v168_v49 }
 0x139   :  { %169 = vrcp.f32 %v143_v50  ;;  %v155_v54 = vand.u32 2147483648, %v143_v50  ;;  %v153_v56 = vand.u32 2147483647, %v143_v50  ;;  %vm149_vm1 = vweird.f32 %v143_v50 }
 0x13b   :  { %v156_v58 = vor.u32 1.1754944e-38, %v155_v54  ;;  %vm154_vm4 = vcmp.eq.f32.partialorder %v153_v56, 8.507059e+37 }
 0x13f   :  { %v170_v51 = vpop.eup %169 }
 0x140   :  { %v145_v52 = vmul.f32 %v170_v51, %v143_v50  ;;  %vm150_vm0 = vweird.f32 %v170_v51 }
 0x141   :  { %vm151_vm2 = vmor %vm149_vm1, %vm150_vm0 }
 0x142   :  { %v146_v53 = vsub.f32 1.0, %v145_v52 }
 0x144   :  { %v147_v55 = vmul.f32 %v170_v51, %v146_v53 }
 0x146   :  { %v148_v57 = vadd.f32 %v170_v51, %v147_v55 }
 0x148   :  { %v152_v59 = vsel %vm151_vm2, %v170_v51, %v148_v57 }
 0x149   :  { %v157_v60 = vsel %vm154_vm4, %v156_v58, %v152_v59 }
 0x14a   :  { %160 = vst.msk [vmem:[%s326_s5] sm:$0x1] %vm159_vm3, %v157_v60 }

</bundles_post_ra>
